<compile_context>
chip_gen: v6e
topology: v6e:2x2x1
jax: 0.10.0
libtpu: 0.0.40
codegen_flags: <defaults>
</compile_context>

<pallas_src>
import functools

import jax
import jax.numpy as jnp
from jax.experimental import pallas as pl
from jax.experimental.pallas import tpu as pltpu


def _mixed_entropy_kernel(logits_ref, target_ref, out_ref, *,
                          n_valid, c_ce, c_rev, exp_in_bf16):
    i = pl.program_id(0)
    x = logits_ref[...].astype(jnp.float32)              # (TN, C), cast after DMA
    t = target_ref[...]                                   # (TN, 1) int32 labels
    tn, c = x.shape

    # Row-validity mask for the (possibly padded) last tile.
    row = jax.lax.broadcasted_iota(jnp.int32, (tn, 1), 0) + i * tn
    valid = row < n_valid                                  # (TN, 1)

    # Shared shifted stream xm = x - max(x); reused for both the exp reduction
    # and the target-logit extraction (no float one-hot multiply).
    m = jnp.max(x, axis=1, keepdims=True)                  # (TN, 1)
    xm = x - m                                             # (TN, C)

    col = jax.lax.broadcasted_iota(jnp.int32, (tn, c), 1)
    xm_t = jnp.sum(jnp.where(col == t, xm, 0.0),
                   axis=1, keepdims=True)                  # (TN, 1) = logit_t - m

    if exp_in_bf16:                                        # optional bf16 EUP path (v6e/v7x)
        e = jnp.exp(xm.astype(jnp.bfloat16)).astype(jnp.float32)
    else:
        e = jnp.exp(xm)
    s = jnp.sum(e, axis=1, keepdims=True)                  # (TN, 1) sum exp(x - m)
    log_s = jnp.log(s)                                     # per-row only

    ce_raw = log_s - xm_t                                  # lse - logit_t
    ce_rows = jnp.where(valid, ce_raw, 0.0)                # masked CE terms
    pt_rows = jnp.where(valid, jnp.exp(-ce_raw), 0.0)      # p[n, y_n] (no divide)

    # Per-tile partial of: alpha*mean(CE) + beta*A*mean(p_target).
    partial = c_ce * jnp.sum(ce_rows) + c_rev * jnp.sum(pt_rows)
    out_ref[...] = jnp.broadcast_to(partial, out_ref.shape)


def mixed_entropy(logits, target, *, alpha=0.1, beta=0.6, neg_inf=-4.0,
                  max_tile_rows=None, exp_in_bf16=False):
    """logits: (N, C) float (any dtype); target: (N,) int class ids. Returns scalar loss."""
    N, C = logits.shape
    itemsize = jnp.dtype(logits.dtype).itemsize

    # Sublane packing of the logits dtype: f32 -> 8, bf16/f16 -> 16, int8/fp8 -> 32.
    pack = {4: 8, 2: 16, 1: 32}.get(itemsize, 8)

    # Generation-aware VMEM budget.
    try:
        vmem_cap = pltpu.get_tpu_info().vmem_capacity_bytes
    except Exception:
        vmem_cap = 64 * 1024 * 1024
    small_vmem = vmem_cap < 96 * 1024 * 1024               # v7x-class: 64 MiB physical
    vmem_limit = (32 if small_vmem else 96) * 1024 * 1024  # scoped limit to request

    # Per-row working set: double-buffered native-dtype tile + ~3 full-width f32
    # intermediates (cast / xm / exp stream) + the lane-padded (tn,1) target column.
    per_row = 2 * C * itemsize + 3 * C * 4 + 2 * 128 * 4
    budget = int(vmem_limit * 0.75)
    tn = budget // max(1, per_row)
    tn = max(pack, min(8192, tn))
    tn = (tn // pack) * pack
    if max_tile_rows is not None:
        tn = max(pack, min(tn, (int(max_tile_rows) // pack) * pack))
    # On 2-TensorCore parts keep >= ~8 grid steps so "parallel" can use both cores.
    if small_vmem and N >= 8 * pack:
        cap = ((N + 7) // 8 + pack - 1) // pack * pack
        tn = min(tn, cap)
    if N <= tn:
        tn = N                        # single full-extent block: always legal
    grid = (pl.cdiv(N, tn),)
    num_tiles = grid[0]

    targets = target.astype(jnp.int32).reshape(N, 1)

    alpha = float(alpha)
    beta = float(beta)
    A = float(neg_inf)
    kernel = functools.partial(
        _mixed_entropy_kernel,
        n_valid=N,
        c_ce=alpha / N,               # alpha * mean over rows of CE terms
        c_rev=beta * A / N,           # +beta*A*mean(p_target) piece of -beta*revCE
        exp_in_bf16=bool(exp_in_bf16),
    )

    cost = pl.CostEstimate(
        flops=6 * N * C,
        transcendentals=N * C + 2 * N,
        bytes_accessed=N * C * itemsize + N * 4 + num_tiles * 8 * 128 * 4,
    )

    partials = pl.pallas_call(
        kernel,
        out_shape=jax.ShapeDtypeStruct((num_tiles, 8, 128), jnp.float32),
        grid=grid,
        in_specs=[
            pl.BlockSpec((tn, C), lambda i: (i, 0)),   # row tile of logits (native dtype)
            pl.BlockSpec((tn, 1), lambda i: (i, 0)),   # matching labels
        ],
        out_specs=pl.BlockSpec((1, 8, 128), lambda i: (i, 0, 0)),  # lane-dense partial per tile
        compiler_params=pltpu.CompilerParams(
            dimension_semantics=("parallel",),          # independent tiles; megacore-friendly
            vmem_limit_bytes=vmem_limit,
        ),
        cost_estimate=cost,
    )(logits, targets)

    # loss = alpha*CE - beta*revCE ; revCE = A - A*mean(p_target)
    return (-beta * A) + jnp.sum(partials[:, 0, 0])


def _reference(logits, target, alpha=0.1, beta=0.6, A=-4.0):
    # Pure-JAX mirror of the PyTorch forward (full softmax + gather), for checking.
    x = logits.astype(jnp.float32)
    p = jax.nn.softmax(x, axis=1)
    n = x.shape[0]
    gt = p[jnp.arange(n), target]
    rev = (jnp.sum(-A * gt) + jnp.sum(A * p)) / n
    logp = jax.nn.log_softmax(x, axis=1)
    ce = -jnp.mean(logp[jnp.arange(n), target])
    return alpha * ce - beta * rev


if __name__ == "__main__":
    key = jax.random.PRNGKey(0)
    k1, k2, k3, k4 = jax.random.split(key, 4)

    # Case 1: tiny f32 problem, single full-extent tile.
    n1, c1 = 8, 16
    logits1 = jax.random.normal(k1, (n1, c1), dtype=jnp.float32)
    target1 = jax.random.randint(k2, (n1,), 0, c1, dtype=jnp.int32)
    loss1 = jax.block_until_ready(mixed_entropy(logits1, target1))
    ref1 = _reference(logits1, target1)
    assert jnp.allclose(loss1, ref1, atol=1e-5, rtol=1e-5), (loss1, ref1)

    # Case 2: bf16 logits on the wire, multiple row tiles, masked partial last tile.
    n2, c2 = 300, 128
    logits2 = jax.random.normal(k3, (n2, c2), dtype=jnp.float32).astype(jnp.bfloat16)
    target2 = jax.random.randint(k4, (n2,), 0, c2, dtype=jnp.int32)
    loss2 = jax.block_until_ready(mixed_entropy(logits2, target2, max_tile_rows=64))
    ref2 = _reference(logits2, target2)
    assert jnp.allclose(loss2, ref2, atol=1e-4, rtol=1e-4), (loss2, ref2)

    print("KERNEL_OK")
</pallas_src>

<mosaic_0001>
module attributes {stable_mosaic.version = 11 : i64} {
  func.func @_mixed_entropy_kernel(%arg0: i32, %arg1: memref<8x16xf32, #tpu.memory_space<vmem>>, %arg2: memref<8x1xi32, #tpu.memory_space<vmem>>, %arg3: memref<1x8x128xf32, #tpu.memory_space<vmem>>) attributes {dimension_semantics = [#tpu.dimension_semantics<parallel>], iteration_bounds = array<i64: 1>, scalar_prefetch = 0 : i64, scratch_operands = 0 : i64, tpu.core_type = #tpu.core_type<tc>, window_params = [{transform_indices = @transform_0, window_bounds = array<i64: 8, 16>}, {transform_indices = @transform_1, window_bounds = array<i64: 8, 1>}, {transform_indices = @transform_2, window_bounds = array<i64: 1, 8, 128>}]} {
    %c0 = arith.constant 0 : index
    %c0_0 = arith.constant 0 : index
    %0 = vector.load %arg1[%c0, %c0_0] : memref<8x16xf32, #tpu.memory_space<vmem>>, vector<8x16xf32>
    %c0_1 = arith.constant 0 : index
    %c0_2 = arith.constant 0 : index
    %1 = vector.load %arg2[%c0_1, %c0_2] : memref<8x1xi32, #tpu.memory_space<vmem>>, vector<8x1xi32>
    %2 = tpu.iota {dimensions = array<i32: 0>} : vector<8x1xi32>
    %c8_i32 = arith.constant 8 : i32
    %3 = arith.muli %arg0, %c8_i32 : i32
    %4 = vector.broadcast %3 : i32 to vector<8x1xi32>
    %5 = arith.addi %2, %4 : vector<8x1xi32>
    %c8_i32_3 = arith.constant 8 : i32
    %6 = vector.broadcast %c8_i32_3 : i32 to vector<8x1xi32>
    %7 = arith.cmpi slt, %5, %6 : vector<8x1xi32>
    %cst = arith.constant dense<0xFF800000> : vector<8xf32>
    %8 = vector.multi_reduction <maximumf>, %0, %cst [1] : vector<8x16xf32> to vector<8xf32>
    %9 = vector.shape_cast %8 : vector<8xf32> to vector<8x1xf32>
    %10 = vector.broadcast %9 : vector<8x1xf32> to vector<8x16xf32>
    %11 = arith.subf %0, %10 : vector<8x16xf32>
    %12 = tpu.iota {dimensions = array<i32: 1>} : vector<8x16xi32>
    %13 = vector.broadcast %1 : vector<8x1xi32> to vector<8x16xi32>
    %14 = arith.cmpi eq, %12, %13 : vector<8x16xi32>
    %cst_4 = arith.constant 0.000000e+00 : f32
    %15 = vector.broadcast %cst_4 : f32 to vector<8x16xf32>
    %16 = arith.select %14, %11, %15 : vector<8x16xi1>, vector<8x16xf32>
    %cst_5 = arith.constant dense<0.000000e+00> : vector<8xf32>
    %17 = vector.multi_reduction <add>, %16, %cst_5 [1] : vector<8x16xf32> to vector<8xf32>
    %18 = vector.shape_cast %17 : vector<8xf32> to vector<8x1xf32>
    %19 = math.exp %11 : vector<8x16xf32>
    %cst_6 = arith.constant dense<0.000000e+00> : vector<8xf32>
    %20 = vector.multi_reduction <add>, %19, %cst_6 [1] : vector<8x16xf32> to vector<8xf32>
    %21 = vector.shape_cast %20 : vector<8xf32> to vector<8x1xf32>
    %22 = math.log %21 : vector<8x1xf32>
    %23 = arith.subf %22, %18 : vector<8x1xf32>
    %cst_7 = arith.constant 0.000000e+00 : f32
    %24 = vector.broadcast %cst_7 : f32 to vector<8x1xf32>
    %25 = arith.select %7, %23, %24 : vector<8x1xi1>, vector<8x1xf32>
    %cst_8 = arith.constant 0.000000e+00 : f32
    %26 = vector.broadcast %cst_8 : f32 to vector<8x1xf32>
    %27 = arith.subf %26, %23 : vector<8x1xf32>
    %28 = math.exp %27 : vector<8x1xf32>
    %cst_9 = arith.constant 0.000000e+00 : f32
    %29 = vector.broadcast %cst_9 : f32 to vector<8x1xf32>
    %30 = arith.select %7, %28, %29 : vector<8x1xi1>, vector<8x1xf32>
    %31 = vector.shape_cast %25 : vector<8x1xf32> to vector<1x8x1xf32>
    %cst_10 = arith.constant dense<0.000000e+00> : vector<1xf32>
    %32 = vector.multi_reduction <add>, %31, %cst_10 [1, 2] : vector<1x8x1xf32> to vector<1xf32>
    %33 = vector.shape_cast %32 : vector<1xf32> to vector<1x1x1xf32>
    %34 = vector.extract %33[0, 0, 0] : f32 from vector<1x1x1xf32>
    %cst_11 = arith.constant 1.250000e-02 : f32
    %35 = arith.mulf %cst_11, %34 : f32
    %36 = vector.shape_cast %30 : vector<8x1xf32> to vector<1x8x1xf32>
    %cst_12 = arith.constant dense<0.000000e+00> : vector<1xf32>
    %37 = vector.multi_reduction <add>, %36, %cst_12 [1, 2] : vector<1x8x1xf32> to vector<1xf32>
    %38 = vector.shape_cast %37 : vector<1xf32> to vector<1x1x1xf32>
    %39 = vector.extract %38[0, 0, 0] : f32 from vector<1x1x1xf32>
    %cst_13 = arith.constant -3.000000e-01 : f32
    %40 = arith.mulf %cst_13, %39 : f32
    %41 = arith.addf %35, %40 : f32
    %42 = vector.broadcast %41 : f32 to vector<1x8x128xf32>
    %c0_14 = arith.constant 0 : index
    %c0_15 = arith.constant 0 : index
    %c0_16 = arith.constant 0 : index
    %43 = vector.load %arg3[%c0_14, %c0_15, %c0_16] : memref<1x8x128xf32, #tpu.memory_space<vmem>>, vector<1x8x128xf32>
    tpu.vector_store %arg3[%c0_14, %c0_15, %c0_16], %42 {strides = array<i32>} : memref<1x8x128xf32, #tpu.memory_space<vmem>>, vector<1x8x128xf32>,
    return
  }
  func.func @transform_0(%arg0: i32) -> (i32, i32) {
    %c0_i32 = arith.constant 0 : i32
    %c0_i32_0 = arith.constant 0 : i32
    return %arg0, %c0_i32 : i32, i32
  }
  func.func @transform_1(%arg0: i32) -> (i32, i32) {
    %c0_i32 = arith.constant 0 : i32
    %c0_i32_0 = arith.constant 0 : i32
    return %arg0, %c0_i32 : i32, i32
  }
  func.func @transform_2(%arg0: i32) -> (i32, i32, i32) {
    %c0_i32 = arith.constant 0 : i32
    %c0_i32_0 = arith.constant 0 : i32
    %c0_i32_1 = arith.constant 0 : i32
    return %arg0, %c0_i32, %c0_i32_0 : i32, i32, i32
  }
}

</mosaic_0001>

<bundles_post_ra>
// kernel: tpu_custom_call.1
= control target key start
LH: loop header
LB: loop body
LE: loop exit
PB: predicated region body
PF: predicated region fallthrough
CT: control target
= control target key end

     0   :  { %vm20_vm0 = vcmask 130048   ;;  %s152_s0 = inlined_call_operand.vmem [shape: f32[8,16], index: 0, kind: input, shape index: {}]   ;;  %s153_s1 = inlined_call_operand.vmem [shape: s32[8,1], index: 1, kind: input, shape index: {}]   ;;  %s154_s2 = inlined_call_operand.hbm [shape: f32[1,8,128], index: 2, kind: output, shape index: {}]  }
   0x1   :  { %v12_v0 = vld [vmem:[%s152_s0] sm:$0xff] }
   0x2   :  { %7 = vsyncpa [#allocation3], 0  ;;  %v21_v1 = vsel %vm20_vm0, %v12_v0, -inf  ;;  %v123_v2 = vmov 0   ;;  %v13_v3 = vld [vmem:[%s153_s1] sm:$0xff]  ;;  %v25_v7 = vlaneseq  ;;  %vm48_vm2 = vcmask 7168  }
   0x3   :  { %94 = vset.pattern.permute.xlu0 %v123_v2  ;;  %s124_s15 = smov [#allocation2]  }
   0x4   :  { %22 = vmax.xlane.f32.xlu0 %v21_v1  ;;  %v26_v8 = vand.u32 127, %v25_v7  ;;  %s80_s16 = sshll.u32 %s124_s15, 4  ;;  %s81_s16 = int_to_ptr.vmem [resolvable:$true] %s80_s16 }
   0x5   :  { %s101_s18 = scalar_lea.vmem %s81_s16, 128  ;;  %p106_p1 = scmp.lt.s32.totalorder %s81_s16, %s81_s16 }
   0x6   :  { %p102_p0 = scmp.ne.s32.totalorder %s81_s16, %s101_s18  ;;  %p107_p2 = scmp.lt.s32.totalorder %s101_s18, %s101_s18 }
   0x8   :  { %p108_p3 = por %p107_p2, %p106_p1 }
   0xa   :  { %p109_p4 = pnand %p108_p3, %p102_p0 }
  0x1a   :  { %28 = vperm.xlu0 %94, %v13_v3  }
  0x8d   :  { %v23_v4 = vpop.xlane.xlu0 %22 }
  0x8e   :  { %v24_v5 = vsub.f32 %v12_v0, %v23_v4 }
  0x90   :  { %v35_v6 = vmul.f32 1.442695, %v24_v5 }
  0x92   :  { %95 = vpow2.f32 %v35_v6 }
  0x95   :  { %v29_v9 = vpop.permute.xlu0 %28 }
  0x96   :  { %vm30_vm1 = vcmp.eq.s32.totalorder %v26_v8, %v29_v9 }
  0x97   :  { %v31_v12 = vsel %vm30_vm1, %v24_v5, 0.0 }
  0x98   :  { %v32_v13 = vsel %vm20_vm0, %v31_v12, 0.0 }
  0x9f   :  { %v96_v10 = vpop.eup %95 }
  0xa0   :  { %v37_v11 = vsel %vm20_vm0, %v96_v10, 0.0 }
  0xa1   :  { %38 = vadd.xlane.f32.xlu1 %v37_v11 }
  0xa5   :  { %33 = vadd.xlane.f32.xlu1 %v32_v13 }
 0x12a   :  { %v39_v14 = vpop.xlane.xlu1 %38 }
 0x12b   :  { %97 = vlog2.f32 %v39_v14 }
 0x12e   :  { %v34_v17 = vpop.xlane.xlu1 %33 }
 0x138   :  { %v98_v15 = vpop.eup %97 }
 0x139   :  { %v41_v16 = vmul.f32 0.6931472, %v98_v15 }
 0x13b   :  { %v42_v18 = vsub.f32 %v41_v16, %v34_v17 }
 0x13d   :  { %v44_v19 = vsub.f32 0.0, %v42_v18  ;;  %v49_v20 = vsel %vm48_vm2, %v42_v18, 0.0 }
 0x13e   :  { %50 = vadd.xlane.f32.xlu1 %v49_v20 }
 0x13f   :  { %v45_v21 = vmul.f32 1.442695, %v44_v19 }
 0x141   :  { %99 = vpow2.f32 %v45_v21 }
 0x14e   :  { %v100_v22 = vpop.eup %99 }
 0x14f   :  { %v60_v23 = vsel %vm48_vm2, %v100_v22, 0.0 }
 0x150   :  { %61 = vadd.xlane.f32.xlu1 %v60_v23 }
 0x1c7   :  { %v51_v24 = vpop.xlane.xlu1 %50 }
 0x1c8   :  { %v52_v25 = vrot.slane %v51_v24, 4 }
 0x1ca   :  { %v53_v26 = vadd.f32 %v52_v25, %v51_v24 }
 0x1cc   :  { %v54_v27 = vrot.slane %v53_v26, 2 }
 0x1ce   :  { %v55_v28 = vadd.f32 %v54_v27, %v53_v26 }
 0x1d0   :  { %v56_v29 = vrot.slane %v55_v28, 1 }
 0x1d2   :  { %v57_v30 = vadd.f32 %v56_v29, %v55_v28 }
 0x1d4   :  { %88 = vpush %v57_v30 }
 0x1d9   :  { %v62_v31 = vpop.xlane.xlu1 %61 }
 0x1da   :  { %v63_v32 = vrot.slane %v62_v31, 4 }
 0x1dc   :  { %v64_v33 = vadd.f32 %v63_v32, %v62_v31 }
 0x1de   :  { %v65_v34 = vrot.slane %v64_v33, 2 }
 0x1e0   :  { %v66_v35 = vadd.f32 %v65_v34, %v64_v33 }
 0x1e2   :  { %v67_v36 = vrot.slane %v66_v35, 1 }
 0x1e4   :  { %v68_v37 = vadd.f32 %v67_v36, %v66_v35 }
 0x1e6   :  { %90 = vpush %v68_v37 }
 0x205   :  { %s89_s0 = spop %88 }
 0x206   :  { %s59_s1 = smul.f32 0.0125, %s89_s0 }
 0x217   :  { %s91_s13 = spop %90 }
 0x218   :  { %s70_s14 = smul.f32 -0.3, %s91_s13 }
 0x21a   :  { %s71_s17 = sadd.f32 %s70_s14, %s59_s1 }
 0x21c   :  { %v72_v38 = vstv %s71_s17 }
 0x21d   :  { %73 = vst [vmem:[#allocation2] sm:$0xff] %v72_v38 }
 0x21e   :  { %112 = shalt.err (!%p109_p4)
}
 0x21f   :  { %83 = dma.vmem_to_hbm [thread:$0]  %s81_s16, 128, %s154_s2, [#allocation3]  }
 0x220   :  { %121 = dma.done.wait [#allocation3], 128  }
 0x221   :  { %122 = vsyncadd [#allocation3], 4294967168 }
 0x222   :  { %87 = vsyncpa [#allocation3], 1 }

</bundles_post_ra>
